<compile_context>
chip_gen: v7x
topology: tpu7x:2x2x1
jax: 0.10.0
libtpu: 0.0.40
codegen_flags: <defaults>
</compile_context>

<pallas_src>
import jax
import jax.numpy as jnp
from jax.experimental import pallas as pl
from jax.experimental.pallas import tpu as pltpu

LANES = 128  # f32 vreg lane width


def _round_up(a: int, b: int) -> int:
    return ((a + b - 1) // b) * b


def simplenet_kernel(params_ref, x_ref, o_ref):
    """params_ref: SMEM f32[16] = [w1(5), b1(5), w2(5), b2(1)].
    x_ref / o_ref: VMEM f32[tile_rows, 128] (batch folded onto sublanes x lanes)."""
    # Hoist all scalar reads once per block, before the vector FMA chain.
    w1 = [params_ref[f] for f in range(5)]
    b1 = [params_ref[5 + f] for f in range(5)]
    w2 = [params_ref[10 + f] for f in range(5)]
    b2 = params_ref[15]

    x = x_ref[...]
    acc = jnp.full_like(x, b2)                                # splat b2 (no zeros+add)
    for f in range(5):                                        # statically unrolled, pure VPU
        h = jnp.maximum(x * w1[f] + b1[f], 0.0)               # relu(fc1)_f
        acc = acc + w2[f] * h                                 # fc2 accumulate
    o_ref[...] = acc


def simplenet_forward(x, w1, b1, w2, b2, *, max_block_rows=2048):
    """x: [B,1] f32; w1: [1,5]; b1: [1,5]; w2: [5,1]; b2: [1,1] -> [B,1] f32.
    Weights stored [in, out] (PyTorch weight.T); biases as row vectors."""
    B = x.shape[0]
    if B == 0:
        return jnp.zeros((0, 1), jnp.float32)

    # Pack all 16 parameter scalars into one SMEM-resident array.
    params = jnp.concatenate(
        [w1.reshape(-1), b1.reshape(-1), w2.reshape(-1), b2.reshape(-1)]
    ).astype(jnp.float32)                                     # (16,)

    # Lane-dense layout: fold batch onto (rows, 128). Pad ONLY a ragged tail.
    rows = pl.cdiv(B, LANES)
    xf = x.reshape(-1).astype(jnp.float32)
    if B != rows * LANES:
        xf = jnp.pad(xf, (0, rows * LANES - B))
    x2d = xf.reshape(rows, LANES)

    # Tiling policy: aim for >= 8 blocks (pipelining + both v7x cores busy),
    # blocks are multiples of 8 sublanes, capped at 1 MiB (2048 rows) per block.
    target = _round_up(pl.cdiv(rows, 8), 8)
    tile_rows = max(8, min(max_block_rows, target))
    num_blocks = pl.cdiv(rows, tile_rows)                     # ragged last block OK

    out2d = pl.pallas_call(
        simplenet_kernel,
        out_shape=jax.ShapeDtypeStruct((rows, LANES), jnp.float32),
        grid=(num_blocks,),
        in_specs=[
            pl.BlockSpec(memory_space=pltpu.MemorySpace.SMEM),    # packed params (whole array)
            pl.BlockSpec((tile_rows, LANES), lambda i: (i, 0)),   # lane-dense batch tile
        ],
        out_specs=pl.BlockSpec((tile_rows, LANES), lambda i: (i, 0)),
        compiler_params=pltpu.CompilerParams(
            dimension_semantics=("parallel",),
        ),
    )(params, x2d)

    out_flat = out2d.reshape(-1)
    if B != rows * LANES:
        out_flat = out_flat[:B]
    return out_flat.reshape(B, 1)


def init_params(key):
    # Deterministic init mimicking nn.Linear's U(-1/sqrt(fan_in), 1/sqrt(fan_in)).
    k1, k2, k3, k4 = jax.random.split(key, 4)
    bound1 = 1.0  # fan_in = 1
    w1 = jax.random.uniform(k1, (1, 5), jnp.float32, -bound1, bound1)   # [in, out]
    b1 = jax.random.uniform(k2, (1, 5), jnp.float32, -bound1, bound1)
    bound2 = 1.0 / jnp.sqrt(5.0)  # fan_in = 5
    w2 = jax.random.uniform(k3, (5, 1), jnp.float32, -bound2, bound2)   # [in, out]
    b2 = jax.random.uniform(k4, (1, 1), jnp.float32, -bound2, bound2)
    return w1, b1, w2, b2


def reference_forward(x, w1, b1, w2, b2):
    h = jnp.maximum(x @ w1 + b1, 0.0)
    return h @ w2 + b2


if __name__ == "__main__":
    key = jax.random.PRNGKey(0)
    kx, kp = jax.random.split(key)
    w1, b1, w2, b2 = init_params(kp)

    # Small batches consistent with the PyTorch module:
    #  8    -> tiny batch, single block
    #  300  -> ragged tail (B not a multiple of 128)
    #  1024 -> lane-aligned path (no wrapper pad, no output slice)
    for B in (8, 300, 1024):
        x = jax.random.normal(jax.random.fold_in(kx, B), (B, 1), jnp.float32)
        out = jax.block_until_ready(simplenet_forward(x, w1, b1, w2, b2))
        ref = reference_forward(x, w1, b1, w2, b2)
        assert out.shape == (B, 1)
        assert jnp.allclose(out, ref, atol=1e-5, rtol=1e-5)

    print("KERNEL_OK")
</pallas_src>

<mosaic_0001>
module attributes {stable_mosaic.version = 11 : i64} {
  func.func @simplenet_kernel(%arg0: i32, %arg1: memref<16xf32, #tpu.memory_space<smem>>, %arg2: memref<8x128xf32, #tpu.memory_space<vmem>>, %arg3: memref<8x128xf32, #tpu.memory_space<vmem>>) attributes {dimension_semantics = [#tpu.dimension_semantics<parallel>], iteration_bounds = array<i64: 1>, scalar_prefetch = 0 : i64, scratch_operands = 0 : i64, tpu.core_type = #tpu.core_type<tc>, window_params = [{transform_indices = @transform_0, window_bounds = array<i64: 16>}, {transform_indices = @transform_1, window_bounds = array<i64: 8, 128>}, {transform_indices = @transform_2, window_bounds = array<i64: 8, 128>}]} {
    %c0 = arith.constant 0 : index
    %0 = memref.load %arg1[%c0] : memref<16xf32, #tpu.memory_space<smem>>
    %c1 = arith.constant 1 : index
    %1 = memref.load %arg1[%c1] : memref<16xf32, #tpu.memory_space<smem>>
    %c2 = arith.constant 2 : index
    %2 = memref.load %arg1[%c2] : memref<16xf32, #tpu.memory_space<smem>>
    %c3 = arith.constant 3 : index
    %3 = memref.load %arg1[%c3] : memref<16xf32, #tpu.memory_space<smem>>
    %c4 = arith.constant 4 : index
    %4 = memref.load %arg1[%c4] : memref<16xf32, #tpu.memory_space<smem>>
    %c5 = arith.constant 5 : index
    %5 = memref.load %arg1[%c5] : memref<16xf32, #tpu.memory_space<smem>>
    %c6 = arith.constant 6 : index
    %6 = memref.load %arg1[%c6] : memref<16xf32, #tpu.memory_space<smem>>
    %c7 = arith.constant 7 : index
    %7 = memref.load %arg1[%c7] : memref<16xf32, #tpu.memory_space<smem>>
    %c8 = arith.constant 8 : index
    %8 = memref.load %arg1[%c8] : memref<16xf32, #tpu.memory_space<smem>>
    %c9 = arith.constant 9 : index
    %9 = memref.load %arg1[%c9] : memref<16xf32, #tpu.memory_space<smem>>
    %c10 = arith.constant 10 : index
    %10 = memref.load %arg1[%c10] : memref<16xf32, #tpu.memory_space<smem>>
    %c11 = arith.constant 11 : index
    %11 = memref.load %arg1[%c11] : memref<16xf32, #tpu.memory_space<smem>>
    %c12 = arith.constant 12 : index
    %12 = memref.load %arg1[%c12] : memref<16xf32, #tpu.memory_space<smem>>
    %c13 = arith.constant 13 : index
    %13 = memref.load %arg1[%c13] : memref<16xf32, #tpu.memory_space<smem>>
    %c14 = arith.constant 14 : index
    %14 = memref.load %arg1[%c14] : memref<16xf32, #tpu.memory_space<smem>>
    %c15 = arith.constant 15 : index
    %15 = memref.load %arg1[%c15] : memref<16xf32, #tpu.memory_space<smem>>
    %c0_0 = arith.constant 0 : index
    %c0_1 = arith.constant 0 : index
    %16 = vector.load %arg2[%c0_0, %c0_1] : memref<8x128xf32, #tpu.memory_space<vmem>>, vector<8x128xf32>
    %17 = vector.broadcast %15 : f32 to vector<8x128xf32>
    %18 = vector.broadcast %0 : f32 to vector<8x128xf32>
    %19 = arith.mulf %16, %18 : vector<8x128xf32>
    %20 = vector.broadcast %5 : f32 to vector<8x128xf32>
    %21 = arith.addf %19, %20 : vector<8x128xf32>
    %cst = arith.constant 0.000000e+00 : f32
    %22 = vector.broadcast %cst : f32 to vector<8x128xf32>
    %23 = arith.maximumf %21, %22 : vector<8x128xf32>
    %24 = vector.broadcast %10 : f32 to vector<8x128xf32>
    %25 = arith.mulf %24, %23 : vector<8x128xf32>
    %26 = arith.addf %17, %25 : vector<8x128xf32>
    %27 = vector.broadcast %1 : f32 to vector<8x128xf32>
    %28 = arith.mulf %16, %27 : vector<8x128xf32>
    %29 = vector.broadcast %6 : f32 to vector<8x128xf32>
    %30 = arith.addf %28, %29 : vector<8x128xf32>
    %cst_2 = arith.constant 0.000000e+00 : f32
    %31 = vector.broadcast %cst_2 : f32 to vector<8x128xf32>
    %32 = arith.maximumf %30, %31 : vector<8x128xf32>
    %33 = vector.broadcast %11 : f32 to vector<8x128xf32>
    %34 = arith.mulf %33, %32 : vector<8x128xf32>
    %35 = arith.addf %26, %34 : vector<8x128xf32>
    %36 = vector.broadcast %2 : f32 to vector<8x128xf32>
    %37 = arith.mulf %16, %36 : vector<8x128xf32>
    %38 = vector.broadcast %7 : f32 to vector<8x128xf32>
    %39 = arith.addf %37, %38 : vector<8x128xf32>
    %cst_3 = arith.constant 0.000000e+00 : f32
    %40 = vector.broadcast %cst_3 : f32 to vector<8x128xf32>
    %41 = arith.maximumf %39, %40 : vector<8x128xf32>
    %42 = vector.broadcast %12 : f32 to vector<8x128xf32>
    %43 = arith.mulf %42, %41 : vector<8x128xf32>
    %44 = arith.addf %35, %43 : vector<8x128xf32>
    %45 = vector.broadcast %3 : f32 to vector<8x128xf32>
    %46 = arith.mulf %16, %45 : vector<8x128xf32>
    %47 = vector.broadcast %8 : f32 to vector<8x128xf32>
    %48 = arith.addf %46, %47 : vector<8x128xf32>
    %cst_4 = arith.constant 0.000000e+00 : f32
    %49 = vector.broadcast %cst_4 : f32 to vector<8x128xf32>
    %50 = arith.maximumf %48, %49 : vector<8x128xf32>
    %51 = vector.broadcast %13 : f32 to vector<8x128xf32>
    %52 = arith.mulf %51, %50 : vector<8x128xf32>
    %53 = arith.addf %44, %52 : vector<8x128xf32>
    %54 = vector.broadcast %4 : f32 to vector<8x128xf32>
    %55 = arith.mulf %16, %54 : vector<8x128xf32>
    %56 = vector.broadcast %9 : f32 to vector<8x128xf32>
    %57 = arith.addf %55, %56 : vector<8x128xf32>
    %cst_5 = arith.constant 0.000000e+00 : f32
    %58 = vector.broadcast %cst_5 : f32 to vector<8x128xf32>
    %59 = arith.maximumf %57, %58 : vector<8x128xf32>
    %60 = vector.broadcast %14 : f32 to vector<8x128xf32>
    %61 = arith.mulf %60, %59 : vector<8x128xf32>
    %62 = arith.addf %53, %61 : vector<8x128xf32>
    %c0_6 = arith.constant 0 : index
    %c0_7 = arith.constant 0 : index
    %63 = vector.load %arg3[%c0_6, %c0_7] : memref<8x128xf32, #tpu.memory_space<vmem>>, vector<8x128xf32>
    tpu.vector_store %arg3[%c0_6, %c0_7], %62 {strides = array<i32>} : memref<8x128xf32, #tpu.memory_space<vmem>>, vector<8x128xf32>,
    return
  }
  func.func @transform_0(%arg0: i32) -> i32 {
    %c0_i32 = arith.constant 0 : i32
    %c0_i32_0 = arith.constant 0 : i32
    return %c0_i32 : i32
  }
  func.func @transform_1(%arg0: i32) -> (i32, i32) {
    %c0_i32 = arith.constant 0 : i32
    %c0_i32_0 = arith.constant 0 : i32
    return %arg0, %c0_i32 : i32, i32
  }
  func.func @transform_2(%arg0: i32) -> (i32, i32) {
    %c0_i32 = arith.constant 0 : i32
    %c0_i32_0 = arith.constant 0 : i32
    return %arg0, %c0_i32 : i32, i32
  }
}

</mosaic_0001>

<bundles_post_ra>
// kernel: tpu_custom_call.1
= control target key start
LH: loop header
LB: loop body
LE: loop exit
PB: predicated region body
PF: predicated region fallthrough
CT: control target
= control target key end

     0   :  { %7 = vsyncpa [#allocation4], 0  ;;  %s224_s0 = inlined_call_operand.hbm [shape: f32[16], index: 0, kind: input, shape index: {}]   ;;  %s225_s1 = inlined_call_operand.vmem [shape: f32[1,128], index: 1, kind: input, shape index: {}]   ;;  %s226_s2 = inlined_call_operand.hbm [shape: f32[1,128], index: 2, kind: output, shape index: {}]  }
   0x1   :  { %8 = vsyncpa [#allocation3], 0  ;;  %s118_s11 = scalar_lea.hbm %s224_s0, 16 }
   0x2   :  { %p119_p0 = scmp.ne.s32.totalorder %s224_s0, %s118_s11  ;;  %p122_p1 = scmp.lt.u32.totalorder %s118_s11, %s224_s0 }
   0x4   :  { %p124_p2 = pnand %p122_p1, %p119_p0 }
   0x6   :  { %127 = shalt.err (!%p124_p2)
}
   0x7   :  { %s154_s16 = smov [#allocation2]  }
   0x8   :  { %16 = dma.hbm_to_smem %s224_s0, 16, %s154_s16, [#allocation4]  }
   0x9   :  { %150 = dma.done.wait [#allocation4], 16  }
   0xa   :  { %151 = vsyncadd [#allocation4], 4294967280 }
   0xb   :  { %22 = sfence }
   0xc   :  { %s23_s19 = sld [smem:[#allocation2]]  ;;  %s99_s20 = sld [smem:[#allocation2 + $0x1]]  ;;  %v39_v0 = vld [vmem:[%s225_s1] sm:$0xff] }
   0xd   :  { %s100_s21 = sld [smem:[#allocation2 + $0x2]]  ;;  %s101_s22 = sld [smem:[#allocation2 + $0x3]] }
   0xe   :  { %s102_s23 = sld [smem:[#allocation2 + $0x4]]  ;;  %s103_s24 = sld [smem:[#allocation2 + $0x5]] }
   0xf   :  { %s104_s25 = sld [smem:[#allocation2 + $0x6]]  ;;  %s105_s26 = sld [smem:[#allocation2 + $0x7]] }
  0x10   :  { %s185_s27 = sld [smem:[#allocation2 + $0x8]]  ;;  %s187_s28 = sld [smem:[#allocation2 + $0x9]] }
  0x11   :  { %s192_s0 = sld [smem:[#allocation2 + $0xa]]  ;;  %s194_s3 = sld [smem:[#allocation2 + $0xb]] }
  0x12   :  { %s196_s4 = sld [smem:[#allocation2 + $0xc]]  ;;  %s198_s5 = sld [smem:[#allocation2 + $0xd]]  ;;  %v41_v1 = vstv %s23_s19  ;;  %v49_v2 = vstv %s99_s20 }
  0x13   :  { %s200_s6 = sld [smem:[#allocation2 + $0xf]]  ;;  %v42_v3 = vmul.f32 %v41_v1, %v39_v0  ;;  %v50_v4 = vmul.f32 %v49_v2, %v39_v0  ;;  %v57_v5 = vstv %s100_s21  ;;  %v65_v6 = vstv %s101_s22  ;;  %s202_s1 = sld [smem:[#allocation2 + $0xe]] }
  0x14   :  { %v43_v7 = vstv %s103_s24  ;;  %v58_v8 = vmul.f32 %v57_v5, %v39_v0  ;;  %v66_v9 = vmul.f32 %v65_v6, %v39_v0  ;;  %v73_v10 = vstv %s102_s23 }
  0x15   :  { %v44_v11 = vadd.f32 %v43_v7, %v42_v3  ;;  %v51_v12 = vstv %s104_s25  ;;  %v59_v13 = vstv %s105_s26  ;;  %v74_v14 = vmul.f32 %v73_v10, %v39_v0 }
  0x16   :  { %v52_v15 = vadd.f32 %v51_v12, %v50_v4  ;;  %v60_v16 = vadd.f32 %v59_v13, %v58_v8  ;;  %v67_v17 = vstv %s185_s27  ;;  %v75_v18 = vstv %s187_s28 }
  0x17   :  { %v45_v19 = vmax.f32 %v44_v11, 0.0  ;;  %v46_v20 = vstv %s192_s0  ;;  %v54_v21 = vstv %s194_s3  ;;  %v68_v22 = vadd.f32 %v67_v17, %v66_v9 }
  0x18   :  { %v53_v23 = vmax.f32 %v52_v15, 0.0  ;;  %v61_v24 = vmax.f32 %v60_v16, 0.0  ;;  %v62_v25 = vstv %s196_s4  ;;  %v76_v29 = vadd.f32 %v75_v18, %v74_v14 }
  0x19   :  { %v40_v26 = vstv %s200_s6  ;;  %v47_v27 = vmul.f32 %v46_v20, %v45_v19  ;;  %v69_v28 = vmax.f32 %v68_v22, 0.0  ;;  %v70_v31 = vstv %s198_s5 }
  0x1a   :  { %v55_v30 = vmul.f32 %v54_v21, %v53_v23  ;;  %v63_v33 = vmul.f32 %v62_v25, %v61_v24  ;;  %v77_v34 = vmax.f32 %v76_v29, 0.0  ;;  %v78_v35 = vstv %s202_s1 }
  0x1b   :  { %v48_v32 = vadd.f32 %v47_v27, %v40_v26  ;;  %v71_v37 = vmul.f32 %v70_v31, %v69_v28 }
  0x1c   :  { %v79_v39 = vmul.f32 %v78_v35, %v77_v34 }
  0x1d   :  { %v56_v36 = vadd.f32 %v55_v30, %v48_v32 }
  0x1f   :  { %v64_v38 = vadd.f32 %v63_v33, %v56_v36 }
  0x21   :  { %v72_v40 = vadd.f32 %v71_v37, %v64_v38 }
  0x23   :  { %v80_v41 = vadd.f32 %v79_v39, %v72_v40 }
  0x25   :  { %81 = vst [vmem:[#allocation5] sm:$0xff] %v80_v41 }
  0x26   :  { %86 = vsyncadd [#allocation3], 112  ;;  %s155_s7 = smov [#allocation5]  }
  0x27   :  { %s87_s8 = sshll.u32 %s155_s7, 4  ;;  %s88_s8 = int_to_ptr.vmem [resolvable:$true] %s87_s8 }
  0x28   :  { %s128_s9 = scalar_lea.vmem %s88_s8, 16  ;;  %s132_s10 = scalar_lea.vmem %s88_s8, 128 }
  0x29   :  { %p129_p3 = scmp.ne.s32.totalorder %s88_s8, %s128_s9  ;;  %p133_p4 = scmp.lt.s32.totalorder %s88_s8, %s88_s8 }
  0x2a   :  { %p134_p5 = scmp.lt.s32.totalorder %s132_s10, %s128_s9 }
  0x2c   :  { %p135_p6 = por %p134_p5, %p133_p4 }
  0x2e   :  { %p136_p7 = pnand %p135_p6, %p129_p3 }
  0x30   :  { %139 = shalt.err (!%p136_p7)
}
  0x31   :  { %s140_s13 = scalar_lea.hbm %s226_s2, 16 }
  0x32   :  { %p141_p8 = scmp.ne.s32.totalorder %s226_s2, %s140_s13  ;;  %p144_p9 = scmp.lt.u32.totalorder %s140_s13, %s226_s2 }
  0x34   :  { %p146_p10 = pnand %p144_p9, %p141_p8 }
  0x36   :  { %149 = shalt.err (!%p146_p10)
}
  0x37   :  { %s156_s18 = smov 16   ;;  %s157_s19 = smov 1  }
  0x38   :  { %93 = dma.vmem_to_hbm [thread:$0]  %s88_s8, 16, %s226_s2, [#allocation3], %s156_s18, %s156_s18, %s157_s19  }
  0x39   :  { %152 = dma.done.wait [#allocation3], 128  }
  0x3a   :  { %153 = vsyncadd [#allocation3], 4294967168 }
  0x3b   :  { %97 = vsyncpa [#allocation3], 1 }
  0x3c   :  { %98 = vsyncpa [#allocation4], 1 }

</bundles_post_ra>
